<compile_context>
chip_gen: v6e
topology: v6e:2x2x1
jax: 0.10.0
libtpu: 0.0.40
codegen_flags: <defaults>
</compile_context>

<pallas_src>
import functools

import jax
import jax.numpy as jnp
from jax.experimental import pallas as pl
from jax.experimental.pallas import tpu as pltpu


# ----------------------------------------------------------------------------
# Helpers
# ----------------------------------------------------------------------------
def _pad_amounts(kernel_size, dilation=1):
    if kernel_size % 2 == 0:
        pad_l = dilation * (kernel_size - 2) // 2 + 1
        pad_r = dilation * kernel_size // 2 + 1
    else:
        pad_l = dilation * (kernel_size - 1) // 2 + 1
        pad_r = dilation * (kernel_size - 1) // 2 + 1
    return pad_l, pad_r


_ROLL_SIGN_CACHE = []


def _probe_roll_sign():
    """Determine pltpu.roll's lane-rotation sign convention (runtime probe, cached).

    Returns +1 if pltpu.roll(x, s, axis) == jnp.roll(x, s, axis), -1 if it is
    the inverse rotation, or None if inconclusive (then the kernel falls back
    to a concat-based rotation which is always correct, just slower).
    """
    if _ROLL_SIGN_CACHE:
        return _ROLL_SIGN_CACHE[0]
    sign = None
    try:
        def probe(x_ref, o_ref):
            o_ref[...] = pltpu.roll(x_ref[...], 1, axis=1)

        x = jnp.arange(8 * 128, dtype=jnp.float32).reshape(8, 128)
        y = pl.pallas_call(
            probe, out_shape=jax.ShapeDtypeStruct((8, 128), jnp.float32))(x)
        if bool(jnp.array_equal(y, jnp.roll(x, 1, axis=1))):
            sign = 1
        elif bool(jnp.array_equal(y, jnp.roll(x, -1, axis=1))):
            sign = -1
    except Exception:  # pragma: no cover - defensive fallback, keeps kernel correct
        sign = None
    _ROLL_SIGN_CACHE.append(sign)
    return sign


def _pack_pair(branch_a, branch_b, sign_b):
    """Fuse two branches into tap-folded block weights.

    Branch A reads input rows [C:2C] and writes output rows [0:C]; branch B
    reads input rows [0:C] and writes output rows [C:2C], scaled by sign_b
    (folded through the final conv + bias; valid since tanh(-x) = -tanh(x)).

    Per-branch weights: w1 (K1, Ch, C), b1 (Ch, 1), w2 (K2, C, Ch), b2 (C, 1).
    Returns:
      w1p (2Ch, K1*2C)  column block k = conv1 tap k
      b1p (2Ch, 1)
      w2p (2C, K2*2Ch)  column block k = conv2 tap k
      b2p (2C, 1)
    """
    w1a, b1a, w2a, b2a = branch_a
    w1b, b1b, w2b, b2b = branch_b
    K1, Ch, C = w1a.shape
    K2 = w2a.shape[0]
    w1 = jnp.zeros((K1, 2 * Ch, 2 * C), jnp.float32)
    w1 = w1.at[:, :Ch, C:].set(w1a)            # branch A hidden <- input rows [C:2C]
    w1 = w1.at[:, Ch:, :C].set(w1b)            # branch B hidden <- input rows [0:C]
    w1p = jnp.transpose(w1, (1, 0, 2)).reshape(2 * Ch, K1 * 2 * C)
    b1p = jnp.concatenate([b1a, b1b], axis=0)
    w2 = jnp.zeros((K2, 2 * C, 2 * Ch), jnp.float32)
    w2 = w2.at[:, :C, :Ch].set(w2a)            # branch A output rows [0:C]
    w2 = w2.at[:, C:, Ch:].set(sign_b * w2b)   # branch B output rows [C:2C]
    w2p = jnp.transpose(w2, (1, 0, 2)).reshape(2 * C, K2 * 2 * Ch)
    b2p = jnp.concatenate([b2a, sign_b * b2b], axis=0)
    return w1p, b1p, w2p, b2p


# ----------------------------------------------------------------------------
# Kernel
# ----------------------------------------------------------------------------
def _make_interactor_kernel(L, W, K1, K2, pad_l, pad_r, roll_sign, mm_dtype):
    """One grid step processes TB batch elements packed along the lane axis.

    Every tensor is (rows, W); batch segment b occupies lanes [b*Lp, (b+1)*Lp).
    The L real time steps of a segment live at columns [pad_l, pad_l+L); the
    remaining Lp columns hold the segment's replication padding.  Lanes past
    the last segment (width rounded up to 128) are dead and sliced off outside.
    """

    def rot(x, k):
        # Cyclic lane shift: out[:, q] = x[:, (q + k) % W].
        k = k % W
        if k == 0:
            return x
        if roll_sign is None:
            return jnp.concatenate([x[:, k:], x[:, :k]], axis=1)
        return pltpu.roll(x, (W - k) if roll_sign > 0 else k, axis=1)

    def rep_pad(z, pos):
        # Per-segment replication padding: copy the first/last valid column of
        # each Lp-wide segment into its pad columns via lane rolls + masked
        # selects (XLU/VPU only; no gathers, no O(L^2) pad matmul).  Wrapped
        # roll values land only in pad columns / dead lanes (see module note).
        for j in range(1, pad_l + 1):
            z = jnp.where(pos == (pad_l - j), rot(z, j), z)
        for j in range(1, pad_r + 1):
            z = jnp.where(pos == (pad_l + L - 1 + j), rot(z, -j), z)
        return z

    def kernel(x_ref, pos_ref, w1_ref, b1_ref, w2_ref, b2_ref, out_ref):
        X = x_ref[0].astype(jnp.float32)    # (2C, W): rows [x_even_pad ; x_odd_pad]
        pos = pos_ref[...]                  # (1, W) int32: column index in segment

        def fused_pair(inp, p):
            # Two branches at once with tap-folded block weights:
            #   conv(K1) -> LeakyReLU(0.01) -> Dropout(identity) -> conv(K2) -> tanh
            # Taps are stacked along the contraction axis -> ONE MXU matmul per
            # conv layer (contraction K1*2C / K2*2Ch instead of 2C / 2Ch).
            stack1 = jnp.concatenate([rot(inp, k) for k in range(K1)], axis=0)
            h = jnp.dot(w1_ref[p].astype(mm_dtype), stack1.astype(mm_dtype),
                        preferred_element_type=jnp.float32) + b1_ref[p]
            h = jnp.maximum(h, 0.01 * h)               # LeakyReLU(0.01)
            # TODO(synk): training-mode Dropout(p=0.5) not implemented (eval: identity).
            # conv2 output at column pad_l + s reads h columns s .. s+K2-1.
            stack2 = jnp.concatenate([rot(h, k - pad_l) for k in range(K2)], axis=0)
            z = jnp.dot(w2_ref[p].astype(mm_dtype), stack2.astype(mm_dtype),
                        preferred_element_type=jnp.float32) + b2_ref[p]
            return jnp.tanh(z)                         # (2C, W)

        # Pair 1: rows -> [psi(x_odd) ; phi(x_even)].  Replication-pad it so the
        # product below is replication padded too (pair 2's conv taps need it).
        z1 = rep_pad(fused_pair(X, 0), pos)
        # Rows -> [c ; d]; replication pad distributes over elementwise * / exp.
        cd = X * jnp.exp(z1)
        # Pair 2: rows -> [U(d) ; -P(c)]  (P's sign folded into weights/bias).
        z2 = fused_pair(cd, 1)
        # Rows -> [x_even_update ; x_odd_update], valid at columns [pad_l, pad_l+L).
        out_ref[0] = (cd + z2).astype(out_ref.dtype)

    return kernel


# ----------------------------------------------------------------------------
# Wrapper
# ----------------------------------------------------------------------------
@functools.partial(jax.jit, static_argnums=(2, 3, 4, 5, 6))
def _interactor_impl(x, params, kernel_size, hidden_size, max_lane_tile,
                     matmul_dtype, roll_sign):
    B, T, C = x.shape
    assert T % 2 == 0, "sequence length must be even"
    L = T // 2
    K1, K2 = kernel_size, 3
    pad_l, pad_r = _pad_amounts(K1)
    Lp = L + pad_l + pad_r
    L1 = Lp - K1 + 1
    assert L1 - K2 + 1 == L, "padding/kernel combination must preserve length"
    Ch = int(C * hidden_size)

    # ---- Lane-tile sizing ---------------------------------------------------
    # Rough per-lane f32 working set (in/out blocks double-buffered, conv tap
    # stacks, a handful of full-width temporaries); cap W so it stays well
    # under VMEM on every generation (v7x has only 64 MiB).
    rows_live = (4 * (2 * C) + K1 * 2 * C + K2 * 2 * Ch
                 + 6 * (2 * C) + 3 * (2 * Ch))
    vmem_target = 24 * 1024 * 1024
    w_cap = max(128, min(max_lane_tile, (vmem_target // (4 * rows_live)) // 128 * 128))

    # Pick TB = batch elements packed per lane tile.  B need not divide evenly
    # (the batch is zero-padded to G*TB); keep G >= 2 whenever B >= 2 so the
    # "parallel" grid axis can be sharded across TensorCores.  Minimize total
    # padded lanes, tie-break towards fewer grid steps.
    tb_cap = max(1, min((B + 1) // 2 if B >= 2 else 1, w_cap // Lp))
    best = None
    for tb in range(1, tb_cap + 1):
        g = -(-B // tb)
        wv = tb * Lp
        w = max(128, -(-wv // 128) * 128)
        key = (g * w, g)
        if best is None or key < best[0]:
            best = (key, tb, g, wv, w)
    _, TB, G, Wv, W = best
    Bp = G * TB

    # ---- Pack the input (one transpose + one replication pad, all jit-fused) --
    #   xp[g, par*C + c, b*Lp + pad_l + t] = x[g*TB + b, 2*t + par, c]
    xb = x if Bp == B else jnp.pad(x, ((0, Bp - B), (0, 0), (0, 0)))
    y = xb.reshape(G, TB, L, 2, C).transpose(0, 3, 4, 1, 2)       # (G, 2, C, TB, L)
    y = y.reshape(G, 2 * C, TB, L)
    y = jnp.pad(y, ((0, 0), (0, 0), (0, 0), (pad_l, pad_r)), mode="edge")
    xp = y.reshape(G, 2 * C, Wv)
    if W > Wv:
        xp = jnp.pad(xp, ((0, 0), (0, 0), (0, W - Wv)))
    pos = (jnp.arange(W, dtype=jnp.int32) % Lp).reshape(1, W)

    # ---- Fused, tap-folded weights: pair 1 = (psi, phi), pair 2 = (U, -P) -----
    w1_a, b1_a, w2_a, b2_a = _pack_pair(params["psi"], params["phi"], 1.0)
    w1_b, b1_b, w2_b, b2_b = _pack_pair(params["U"], params["P"], -1.0)
    w1 = jnp.stack([w1_a, w1_b]).astype(matmul_dtype)   # (2, 2Ch, K1*2C)
    b1 = jnp.stack([b1_a, b1_b])                        # (2, 2Ch, 1)
    w2 = jnp.stack([w2_a, w2_b]).astype(matmul_dtype)   # (2, 2C, K2*2Ch)
    b2 = jnp.stack([b2_a, b2_b])                        # (2, 2C, 1)

    kernel = _make_interactor_kernel(L, W, K1, K2, pad_l, pad_r, roll_sign,
                                     matmul_dtype)

    # Advisory cost estimate (2 flops per MAC; 1 exp + 2 tanh per output elem).
    flops = 2 * G * W * (2 * Ch * K1 * 2 * C + 2 * C * K2 * 2 * Ch) * 2
    transcendentals = G * 3 * (2 * C) * W
    mm_itemsize = jnp.dtype(matmul_dtype).itemsize
    bytes_accessed = int(4 * (2 * G * 2 * C * W + W)
                         + (w1.size + w2.size) * mm_itemsize
                         + 4 * (b1.size + b2.size))
    vmem_limit = int(min(48 * 1024 * 1024,
                         max(32 * 1024 * 1024, 3 * 4 * rows_live * W)))

    out = pl.pallas_call(
        kernel,
        out_shape=jax.ShapeDtypeStruct((G, 2 * C, W), x.dtype),
        grid=(G,),
        in_specs=[
            pl.BlockSpec((1, 2 * C, W), lambda g: (g, 0, 0)),  # packed [xe_pad; xo_pad]
            pl.BlockSpec((1, W), lambda g: (0, 0)),            # in-segment position
            pl.BlockSpec(w1.shape, lambda g: (0, 0, 0)),       # conv1 weights (resident)
            pl.BlockSpec(b1.shape, lambda g: (0, 0, 0)),       # conv1 biases
            pl.BlockSpec(w2.shape, lambda g: (0, 0, 0)),       # conv2 weights (resident)
            pl.BlockSpec(b2.shape, lambda g: (0, 0, 0)),       # conv2 biases
        ],
        out_specs=pl.BlockSpec((1, 2 * C, W), lambda g: (g, 0, 0)),
        compiler_params=pltpu.CompilerParams(
            dimension_semantics=("parallel",),
            vmem_limit_bytes=vmem_limit),
        cost_estimate=pl.CostEstimate(flops=flops,
                                      transcendentals=transcendentals,
                                      bytes_accessed=bytes_accessed),
    )(xp, pos, w1, b1, w2, b2)

    # Unpack: valid per-segment window [pad_l, pad_l+L), restore (B, 2C, L).
    out = out[:, :, :Wv].reshape(G, 2 * C, TB, Lp)[..., pad_l:pad_l + L]
    out = out.transpose(0, 2, 1, 3).reshape(Bp, 2 * C, L)[:B]
    return out[:, :C, :], out[:, C:, :]


def interactor_forward(x, params, *, kernel_size=5, hidden_size=1,
                       max_lane_tile=8192, matmul_dtype=jnp.float32):
    """x: (B, T, C) float32. Returns (x_even_update, x_odd_update), each (B, C, T//2).

    matmul_dtype=jnp.bfloat16 halves weight/operand MXU traffic on v6e/v7x at
    ~1e-3 absolute error vs. the f32 PyTorch reference; default stays f32 so
    the result matches the reference to 1e-4.
    """
    roll_sign = _probe_roll_sign()           # runs a tiny kernel once, cached
    return _interactor_impl(x, params, kernel_size, hidden_size,
                            max_lane_tile, matmul_dtype, roll_sign)


# ----------------------------------------------------------------------------
# Deterministic parameter construction (synthetic, not a checkpoint)
# ----------------------------------------------------------------------------
def make_params(key, C, Ch, K1=5, K2=3):
    params = {}
    for i, name in enumerate(("phi", "psi", "U", "P")):
        k1, k2, k3, k4 = jax.random.split(jax.random.fold_in(key, i), 4)
        w1 = 0.1 * jax.random.normal(k1, (K1, Ch, C), jnp.float32)   # (K, out, in)
        b1 = 0.1 * jax.random.normal(k2, (Ch, 1), jnp.float32)
        w2 = 0.1 * jax.random.normal(k3, (K2, C, Ch), jnp.float32)
        b2 = 0.1 * jax.random.normal(k4, (C, 1), jnp.float32)
        params[name] = (w1, b1, w2, b2)
    return params


# ----------------------------------------------------------------------------
# Pure-JAX reference (for correctness check)
# ----------------------------------------------------------------------------
def _branch_ref(x, w1, b1, w2, b2, pad_l, pad_r):
    # x: (B, C, L)
    xp = jnp.pad(x, ((0, 0), (0, 0), (pad_l, pad_r)), mode="edge")
    w1_oik = jnp.transpose(w1, (1, 2, 0))   # (O, I, K)
    y = jax.lax.conv_general_dilated(xp, w1_oik, (1,), "VALID",
                                     dimension_numbers=("NCH", "OIH", "NCH"))
    y = y + b1[None, :, :]
    y = jnp.where(y > 0, y, 0.01 * y)
    w2_oik = jnp.transpose(w2, (1, 2, 0))
    z = jax.lax.conv_general_dilated(y, w2_oik, (1,), "VALID",
                                     dimension_numbers=("NCH", "OIH", "NCH"))
    z = z + b2[None, :, :]
    return jnp.tanh(z)


def interactor_ref(x, params, *, kernel_size=5):
    pad_l, pad_r = _pad_amounts(kernel_size)
    xe = jnp.transpose(x[:, ::2, :], (0, 2, 1))
    xo = jnp.transpose(x[:, 1::2, :], (0, 2, 1))
    d = xo * jnp.exp(_branch_ref(xe, *params["phi"], pad_l, pad_r))
    c = xe * jnp.exp(_branch_ref(xo, *params["psi"], pad_l, pad_r))
    even_up = c + _branch_ref(d, *params["U"], pad_l, pad_r)
    odd_up = d - _branch_ref(c, *params["P"], pad_l, pad_r)
    return even_up, odd_up


# ----------------------------------------------------------------------------
if __name__ == "__main__":
    B, T, C = 2, 16, 4          # batch, sequence length, in_planes
    hidden_size = 1
    Ch = int(C * hidden_size)

    key = jax.random.PRNGKey(0)
    kx, kp = jax.random.split(key)
    x = jax.random.normal(kx, (B, T, C), jnp.float32)
    params = make_params(kp, C, Ch)

    even_up, odd_up = interactor_forward(x, params, kernel_size=5,
                                         hidden_size=hidden_size)
    jax.block_until_ready((even_up, odd_up))

    ref_even, ref_odd = interactor_ref(x, params, kernel_size=5)
    assert even_up.shape == (B, C, T // 2) and odd_up.shape == (B, C, T // 2)
    assert jnp.allclose(even_up, ref_even, atol=1e-4, rtol=1e-4)
    assert jnp.allclose(odd_up, ref_odd, atol=1e-4, rtol=1e-4)

    # Second case: odd batch / different length exercises batch padding and
    # multi-segment (TB > 1) lane packing.
    x2 = jax.random.normal(jax.random.fold_in(kx, 1), (3, 12, C), jnp.float32)
    e2, o2 = interactor_forward(x2, params, kernel_size=5,
                                hidden_size=hidden_size)
    jax.block_until_ready((e2, o2))
    r2e, r2o = interactor_ref(x2, params, kernel_size=5)
    assert jnp.allclose(e2, r2e, atol=1e-4, rtol=1e-4)
    assert jnp.allclose(o2, r2o, atol=1e-4, rtol=1e-4)

    print("KERNEL_OK")
</pallas_src>

<mosaic_0001>
module attributes {stable_mosaic.version = 11 : i64} {
  func.func @probe(%arg0: memref<8x128xf32, #tpu.memory_space<vmem>>, %arg1: memref<8x128xf32, #tpu.memory_space<vmem>>) attributes {dimension_semantics = [], scalar_prefetch = 0 : i64, scratch_operands = 0 : i64, tpu.core_type = #tpu.core_type<tc>} {
    %c0 = arith.constant 0 : index
    %c0_0 = arith.constant 0 : index
    %0 = vector.load %arg0[%c0, %c0_0] : memref<8x128xf32, #tpu.memory_space<vmem>>, vector<8x128xf32>
    %c1_i32 = arith.constant 1 : i32
    %1 = tpu.dynamic_rotate %0 by %c1_i32 dim 1 : vector<8x128xf32>, i32 -> vector<8x128xf32>
    %c0_1 = arith.constant 0 : index
    %c0_2 = arith.constant 0 : index
    %2 = vector.load %arg1[%c0_1, %c0_2] : memref<8x128xf32, #tpu.memory_space<vmem>>, vector<8x128xf32>
    tpu.vector_store %arg1[%c0_1, %c0_2], %1 {strides = array<i32>} : memref<8x128xf32, #tpu.memory_space<vmem>>, vector<8x128xf32>,
    return
  }
}

module attributes {stable_mosaic.version = 11 : i64} {
  func.func @kernel(%arg0: i32, %arg1: memref<1x8x128xf32, #tpu.memory_space<vmem>>, %arg2: memref<1x128xi32, #tpu.memory_space<vmem>>, %arg3: memref<2x8x40xf32, #tpu.memory_space<vmem>>, %arg4: memref<2x8x1xf32, #tpu.memory_space<vmem>>, %arg5: memref<2x8x24xf32, #tpu.memory_space<vmem>>, %arg6: memref<2x8x1xf32, #tpu.memory_space<vmem>>, %arg7: memref<1x8x128xf32, #tpu.memory_space<vmem>>) attributes {dimension_semantics = [#tpu.dimension_semantics<parallel>], iteration_bounds = array<i64: 2>, scalar_prefetch = 0 : i64, scratch_operands = 0 : i64, tpu.core_type = #tpu.core_type<tc>, window_params = [{transform_indices = @transform_0, window_bounds = array<i64: 1, 8, 128>}, {pipeline_mode = #tpu.pipeline_mode<synchronous>, transform_indices = @transform_1, window_bounds = array<i64: 1, 128>}, {pipeline_mode = #tpu.pipeline_mode<synchronous>, transform_indices = @transform_2, window_bounds = array<i64: 2, 8, 40>}, {pipeline_mode = #tpu.pipeline_mode<synchronous>, transform_indices = @transform_3, window_bounds = array<i64: 2, 8, 1>}, {pipeline_mode = #tpu.pipeline_mode<synchronous>, transform_indices = @transform_4, window_bounds = array<i64: 2, 8, 24>}, {pipeline_mode = #tpu.pipeline_mode<synchronous>, transform_indices = @transform_5, window_bounds = array<i64: 2, 8, 1>}, {transform_indices = @transform_6, window_bounds = array<i64: 1, 8, 128>}]} {
    %c0 = arith.constant 0 : index
    %c0_0 = arith.constant 0 : index
    %c0_1 = arith.constant 0 : index
    %0 = vector.load %arg1[%c0, %c0_0, %c0_1] : memref<1x8x128xf32, #tpu.memory_space<vmem>>, vector<1x8x128xf32>
    %1 = vector.shape_cast %0 : vector<1x8x128xf32> to vector<8x128xf32>
    %c0_2 = arith.constant 0 : index
    %c0_3 = arith.constant 0 : index
    %2 = vector.load %arg2[%c0_2, %c0_3] : memref<1x128xi32, #tpu.memory_space<vmem>>, vector<1x128xi32>
    %3 = vector.extract_strided_slice %1 {offsets = [0, 1], sizes = [8, 127], strides = [1, 1]} : vector<8x128xf32> to vector<8x127xf32>
    %4 = vector.extract_strided_slice %1 {offsets = [0, 0], sizes = [8, 1], strides = [1, 1]} : vector<8x128xf32> to vector<8x1xf32>
    %5 = tpu.concatenate %3, %4 in 1 : vector<8x127xf32>, vector<8x1xf32> -> vector<8x128xf32>
    %6 = vector.extract_strided_slice %1 {offsets = [0, 2], sizes = [8, 126], strides = [1, 1]} : vector<8x128xf32> to vector<8x126xf32>
    %7 = vector.extract_strided_slice %1 {offsets = [0, 0], sizes = [8, 2], strides = [1, 1]} : vector<8x128xf32> to vector<8x2xf32>
    %8 = tpu.concatenate %6, %7 in 1 : vector<8x126xf32>, vector<8x2xf32> -> vector<8x128xf32>
    %9 = vector.extract_strided_slice %1 {offsets = [0, 3], sizes = [8, 125], strides = [1, 1]} : vector<8x128xf32> to vector<8x125xf32>
    %10 = vector.extract_strided_slice %1 {offsets = [0, 0], sizes = [8, 3], strides = [1, 1]} : vector<8x128xf32> to vector<8x3xf32>
    %11 = tpu.concatenate %9, %10 in 1 : vector<8x125xf32>, vector<8x3xf32> -> vector<8x128xf32>
    %12 = vector.extract_strided_slice %1 {offsets = [0, 4], sizes = [8, 124], strides = [1, 1]} : vector<8x128xf32> to vector<8x124xf32>
    %13 = vector.extract_strided_slice %1 {offsets = [0, 0], sizes = [8, 4], strides = [1, 1]} : vector<8x128xf32> to vector<8x4xf32>
    %14 = tpu.concatenate %12, %13 in 1 : vector<8x124xf32>, vector<8x4xf32> -> vector<8x128xf32>
    %15 = tpu.concatenate %1, %5, %8, %11, %14 in 0 : vector<8x128xf32>, vector<8x128xf32>, vector<8x128xf32>, vector<8x128xf32>, vector<8x128xf32> -> vector<40x128xf32>
    %c0_4 = arith.constant 0 : index
    %c0_5 = arith.constant 0 : index
    %c0_6 = arith.constant 0 : index
    %16 = vector.load %arg3[%c0_4, %c0_5, %c0_6] : memref<2x8x40xf32, #tpu.memory_space<vmem>>, vector<1x8x40xf32>
    %17 = vector.shape_cast %16 : vector<1x8x40xf32> to vector<8x40xf32>
    %cst = arith.constant dense<0.000000e+00> : vector<8x128xf32>
    %18 = tpu.matmul %17, %15, %cst {dimension_numbers = #tpu.dot_dimension_numbers<[1], [0], [0], [1], [0, 0, 1, 1], [], []>} : vector<8x40xf32>, vector<40x128xf32>, vector<8x128xf32> -> vector<8x128xf32>
    %c0_7 = arith.constant 0 : index
    %c0_8 = arith.constant 0 : index
    %c0_9 = arith.constant 0 : index
    %19 = vector.load %arg4[%c0_7, %c0_8, %c0_9] : memref<2x8x1xf32, #tpu.memory_space<vmem>>, vector<1x8x1xf32>
    %20 = vector.shape_cast %19 : vector<1x8x1xf32> to vector<8x1xf32>
    %21 = vector.broadcast %20 : vector<8x1xf32> to vector<8x128xf32>
    %22 = arith.addf %18, %21 : vector<8x128xf32>
    %cst_10 = arith.constant 0.00999999977 : f32
    %23 = vector.broadcast %cst_10 : f32 to vector<8x128xf32>
    %24 = arith.mulf %23, %22 : vector<8x128xf32>
    %25 = arith.maximumf %22, %24 : vector<8x128xf32>
    %26 = vector.extract_strided_slice %25 {offsets = [0, 125], sizes = [8, 3], strides = [1, 1]} : vector<8x128xf32> to vector<8x3xf32>
    %27 = vector.extract_strided_slice %25 {offsets = [0, 0], sizes = [8, 125], strides = [1, 1]} : vector<8x128xf32> to vector<8x125xf32>
    %28 = tpu.concatenate %26, %27 in 1 : vector<8x3xf32>, vector<8x125xf32> -> vector<8x128xf32>
    %29 = vector.extract_strided_slice %25 {offsets = [0, 126], sizes = [8, 2], strides = [1, 1]} : vector<8x128xf32> to vector<8x2xf32>
    %30 = vector.extract_strided_slice %25 {offsets = [0, 0], sizes = [8, 126], strides = [1, 1]} : vector<8x128xf32> to vector<8x126xf32>
    %31 = tpu.concatenate %29, %30 in 1 : vector<8x2xf32>, vector<8x126xf32> -> vector<8x128xf32>
    %32 = vector.extract_strided_slice %25 {offsets = [0, 127], sizes = [8, 1], strides = [1, 1]} : vector<8x128xf32> to vector<8x1xf32>
    %33 = vector.extract_strided_slice %25 {offsets = [0, 0], sizes = [8, 127], strides = [1, 1]} : vector<8x128xf32> to vector<8x127xf32>
    %34 = tpu.concatenate %32, %33 in 1 : vector<8x1xf32>, vector<8x127xf32> -> vector<8x128xf32>
    %35 = tpu.concatenate %28, %31, %34 in 0 : vector<8x128xf32>, vector<8x128xf32>, vector<8x128xf32> -> vector<24x128xf32>
    %c0_11 = arith.constant 0 : index
    %c0_12 = arith.constant 0 : index
    %c0_13 = arith.constant 0 : index
    %36 = vector.load %arg5[%c0_11, %c0_12, %c0_13] : memref<2x8x24xf32, #tpu.memory_space<vmem>>, vector<1x8x24xf32>
    %37 = vector.shape_cast %36 : vector<1x8x24xf32> to vector<8x24xf32>
    %cst_14 = arith.constant dense<0.000000e+00> : vector<8x128xf32>
    %38 = tpu.matmul %37, %35, %cst_14 {dimension_numbers = #tpu.dot_dimension_numbers<[1], [0], [0], [1], [0, 0, 1, 1], [], []>} : vector<8x24xf32>, vector<24x128xf32>, vector<8x128xf32> -> vector<8x128xf32>
    %c0_15 = arith.constant 0 : index
    %c0_16 = arith.constant 0 : index
    %c0_17 = arith.constant 0 : index
    %39 = vector.load %arg6[%c0_15, %c0_16, %c0_17] : memref<2x8x1xf32, #tpu.memory_space<vmem>>, vector<1x8x1xf32>
    %40 = vector.shape_cast %39 : vector<1x8x1xf32> to vector<8x1xf32>
    %41 = vector.broadcast %40 : vector<8x1xf32> to vector<8x128xf32>
    %42 = arith.addf %38, %41 : vector<8x128xf32>
    %43 = math.tanh %42 : vector<8x128xf32>
    %c2_i32 = arith.constant 2 : i32
    %44 = vector.broadcast %c2_i32 : i32 to vector<1x128xi32>
    %45 = arith.cmpi eq, %2, %44 : vector<1x128xi32>
    %46 = vector.extract_strided_slice %43 {offsets = [0, 1], sizes = [8, 127], strides = [1, 1]} : vector<8x128xf32> to vector<8x127xf32>
    %47 = vector.extract_strided_slice %43 {offsets = [0, 0], sizes = [8, 1], strides = [1, 1]} : vector<8x128xf32> to vector<8x1xf32>
    %48 = tpu.concatenate %46, %47 in 1 : vector<8x127xf32>, vector<8x1xf32> -> vector<8x128xf32>
    %49 = vector.shape_cast %45 : vector<1x128xi1> to vector<1x128xi1>
    %50 = vector.broadcast %49 : vector<1x128xi1> to vector<8x128xi1>
    %51 = arith.select %50, %48, %43 : vector<8x128xi1>, vector<8x128xf32>
    %c1_i32 = arith.constant 1 : i32
    %52 = vector.broadcast %c1_i32 : i32 to vector<1x128xi32>
    %53 = arith.cmpi eq, %2, %52 : vector<1x128xi32>
    %54 = vector.extract_strided_slice %51 {offsets = [0, 2], sizes = [8, 126], strides = [1, 1]} : vector<8x128xf32> to vector<8x126xf32>
    %55 = vector.extract_strided_slice %51 {offsets = [0, 0], sizes = [8, 2], strides = [1, 1]} : vector<8x128xf32> to vector<8x2xf32>
    %56 = tpu.concatenate %54, %55 in 1 : vector<8x126xf32>, vector<8x2xf32> -> vector<8x128xf32>
    %57 = vector.shape_cast %53 : vector<1x128xi1> to vector<1x128xi1>
    %58 = vector.broadcast %57 : vector<1x128xi1> to vector<8x128xi1>
    %59 = arith.select %58, %56, %51 : vector<8x128xi1>, vector<8x128xf32>
    %c0_i32 = arith.constant 0 : i32
    %60 = vector.broadcast %c0_i32 : i32 to vector<1x128xi32>
    %61 = arith.cmpi eq, %2, %60 : vector<1x128xi32>
    %62 = vector.extract_strided_slice %59 {offsets = [0, 3], sizes = [8, 125], strides = [1, 1]} : vector<8x128xf32> to vector<8x125xf32>
    %63 = vector.extract_strided_slice %59 {offsets = [0, 0], sizes = [8, 3], strides = [1, 1]} : vector<8x128xf32> to vector<8x3xf32>
    %64 = tpu.concatenate %62, %63 in 1 : vector<8x125xf32>, vector<8x3xf32> -> vector<8x128xf32>
    %65 = vector.shape_cast %61 : vector<1x128xi1> to vector<1x128xi1>
    %66 = vector.broadcast %65 : vector<1x128xi1> to vector<8x128xi1>
    %67 = arith.select %66, %64, %59 : vector<8x128xi1>, vector<8x128xf32>
    %c11_i32 = arith.constant 11 : i32
    %68 = vector.broadcast %c11_i32 : i32 to vector<1x128xi32>
    %69 = arith.cmpi eq, %2, %68 : vector<1x128xi32>
    %70 = vector.extract_strided_slice %67 {offsets = [0, 127], sizes = [8, 1], strides = [1, 1]} : vector<8x128xf32> to vector<8x1xf32>
    %71 = vector.extract_strided_slice %67 {offsets = [0, 0], sizes = [8, 127], strides = [1, 1]} : vector<8x128xf32> to vector<8x127xf32>
    %72 = tpu.concatenate %70, %71 in 1 : vector<8x1xf32>, vector<8x127xf32> -> vector<8x128xf32>
    %73 = vector.shape_cast %69 : vector<1x128xi1> to vector<1x128xi1>
    %74 = vector.broadcast %73 : vector<1x128xi1> to vector<8x128xi1>
    %75 = arith.select %74, %72, %67 : vector<8x128xi1>, vector<8x128xf32>
    %c12_i32 = arith.constant 12 : i32
    %76 = vector.broadcast %c12_i32 : i32 to vector<1x128xi32>
    %77 = arith.cmpi eq, %2, %76 : vector<1x128xi32>
    %78 = vector.extract_strided_slice %75 {offsets = [0, 126], sizes = [8, 2], strides = [1, 1]} : vector<8x128xf32> to vector<8x2xf32>
    %79 = vector.extract_strided_slice %75 {offsets = [0, 0], sizes = [8, 126], strides = [1, 1]} : vector<8x128xf32> to vector<8x126xf32>
    %80 = tpu.concatenate %78, %79 in 1 : vector<8x2xf32>, vector<8x126xf32> -> vector<8x128xf32>
    %81 = vector.shape_cast %77 : vector<1x128xi1> to vector<1x128xi1>
    %82 = vector.broadcast %81 : vector<1x128xi1> to vector<8x128xi1>
    %83 = arith.select %82, %80, %75 : vector<8x128xi1>, vector<8x128xf32>
    %c13_i32 = arith.constant 13 : i32
    %84 = vector.broadcast %c13_i32 : i32 to vector<1x128xi32>
    %85 = arith.cmpi eq, %2, %84 : vector<1x128xi32>
    %86 = vector.extract_strided_slice %83 {offsets = [0, 125], sizes = [8, 3], strides = [1, 1]} : vector<8x128xf32> to vector<8x3xf32>
    %87 = vector.extract_strided_slice %83 {offsets = [0, 0], sizes = [8, 125], strides = [1, 1]} : vector<8x128xf32> to vector<8x125xf32>
    %88 = tpu.concatenate %86, %87 in 1 : vector<8x3xf32>, vector<8x125xf32> -> vector<8x128xf32>
    %89 = vector.shape_cast %85 : vector<1x128xi1> to vector<1x128xi1>
    %90 = vector.broadcast %89 : vector<1x128xi1> to vector<8x128xi1>
    %91 = arith.select %90, %88, %83 : vector<8x128xi1>, vector<8x128xf32>
    %92 = math.exp %91 : vector<8x128xf32>
    %93 = arith.mulf %1, %92 : vector<8x128xf32>
    %94 = vector.extract_strided_slice %93 {offsets = [0, 1], sizes = [8, 127], strides = [1, 1]} : vector<8x128xf32> to vector<8x127xf32>
    %95 = vector.extract_strided_slice %93 {offsets = [0, 0], sizes = [8, 1], strides = [1, 1]} : vector<8x128xf32> to vector<8x1xf32>
    %96 = tpu.concatenate %94, %95 in 1 : vector<8x127xf32>, vector<8x1xf32> -> vector<8x128xf32>
    %97 = vector.extract_strided_slice %93 {offsets = [0, 2], sizes = [8, 126], strides = [1, 1]} : vector<8x128xf32> to vector<8x126xf32>
    %98 = vector.extract_strided_slice %93 {offsets = [0, 0], sizes = [8, 2], strides = [1, 1]} : vector<8x128xf32> to vector<8x2xf32>
    %99 = tpu.concatenate %97, %98 in 1 : vector<8x126xf32>, vector<8x2xf32> -> vector<8x128xf32>
    %100 = vector.extract_strided_slice %93 {offsets = [0, 3], sizes = [8, 125], strides = [1, 1]} : vector<8x128xf32> to vector<8x125xf32>
    %101 = vector.extract_strided_slice %93 {offsets = [0, 0], sizes = [8, 3], strides = [1, 1]} : vector<8x128xf32> to vector<8x3xf32>
    %102 = tpu.concatenate %100, %101 in 1 : vector<8x125xf32>, vector<8x3xf32> -> vector<8x128xf32>
    %103 = vector.extract_strided_slice %93 {offsets = [0, 4], sizes = [8, 124], strides = [1, 1]} : vector<8x128xf32> to vector<8x124xf32>
    %104 = vector.extract_strided_slice %93 {offsets = [0, 0], sizes = [8, 4], strides = [1, 1]} : vector<8x128xf32> to vector<8x4xf32>
    %105 = tpu.concatenate %103, %104 in 1 : vector<8x124xf32>, vector<8x4xf32> -> vector<8x128xf32>
    %106 = tpu.concatenate %93, %96, %99, %102, %105 in 0 : vector<8x128xf32>, vector<8x128xf32>, vector<8x128xf32>, vector<8x128xf32>, vector<8x128xf32> -> vector<40x128xf32>
    %c1 = arith.constant 1 : index
    %c0_18 = arith.constant 0 : index
    %c0_19 = arith.constant 0 : index
    %107 = vector.load %arg3[%c1, %c0_18, %c0_19] : memref<2x8x40xf32, #tpu.memory_space<vmem>>, vector<1x8x40xf32>
    %108 = vector.shape_cast %107 : vector<1x8x40xf32> to vector<8x40xf32>
    %cst_20 = arith.constant dense<0.000000e+00> : vector<8x128xf32>
    %109 = tpu.matmul %108, %106, %cst_20 {dimension_numbers = #tpu.dot_dimension_numbers<[1], [0], [0], [1], [0, 0, 1, 1], [], []>} : vector<8x40xf32>, vector<40x128xf32>, vector<8x128xf32> -> vector<8x128xf32>
    %c1_21 = arith.constant 1 : index
    %c0_22 = arith.constant 0 : index
    %c0_23 = arith.constant 0 : index
    %110 = vector.load %arg4[%c1_21, %c0_22, %c0_23] : memref<2x8x1xf32, #tpu.memory_space<vmem>>, vector<1x8x1xf32>
    %111 = vector.shape_cast %110 : vector<1x8x1xf32> to vector<8x1xf32>
    %112 = vector.broadcast %111 : vector<8x1xf32> to vector<8x128xf32>
    %113 = arith.addf %109, %112 : vector<8x128xf32>
    %cst_24 = arith.constant 0.00999999977 : f32
    %114 = vector.broadcast %cst_24 : f32 to vector<8x128xf32>
    %115 = arith.mulf %114, %113 : vector<8x128xf32>
    %116 = arith.maximumf %113, %115 : vector<8x128xf32>
    %117 = vector.extract_strided_slice %116 {offsets = [0, 125], sizes = [8, 3], strides = [1, 1]} : vector<8x128xf32> to vector<8x3xf32>
    %118 = vector.extract_strided_slice %116 {offsets = [0, 0], sizes = [8, 125], strides = [1, 1]} : vector<8x128xf32> to vector<8x125xf32>
    %119 = tpu.concatenate %117, %118 in 1 : vector<8x3xf32>, vector<8x125xf32> -> vector<8x128xf32>
    %120 = vector.extract_strided_slice %116 {offsets = [0, 126], sizes = [8, 2], strides = [1, 1]} : vector<8x128xf32> to vector<8x2xf32>
    %121 = vector.extract_strided_slice %116 {offsets = [0, 0], sizes = [8, 126], strides = [1, 1]} : vector<8x128xf32> to vector<8x126xf32>
    %122 = tpu.concatenate %120, %121 in 1 : vector<8x2xf32>, vector<8x126xf32> -> vector<8x128xf32>
    %123 = vector.extract_strided_slice %116 {offsets = [0, 127], sizes = [8, 1], strides = [1, 1]} : vector<8x128xf32> to vector<8x1xf32>
    %124 = vector.extract_strided_slice %116 {offsets = [0, 0], sizes = [8, 127], strides = [1, 1]} : vector<8x128xf32> to vector<8x127xf32>
    %125 = tpu.concatenate %123, %124 in 1 : vector<8x1xf32>, vector<8x127xf32> -> vector<8x128xf32>
    %126 = tpu.concatenate %119, %122, %125 in 0 : vector<8x128xf32>, vector<8x128xf32>, vector<8x128xf32> -> vector<24x128xf32>
    %c1_25 = arith.constant 1 : index
    %c0_26 = arith.constant 0 : index
    %c0_27 = arith.constant 0 : index
    %127 = vector.load %arg5[%c1_25, %c0_26, %c0_27] : memref<2x8x24xf32, #tpu.memory_space<vmem>>, vector<1x8x24xf32>
    %128 = vector.shape_cast %127 : vector<1x8x24xf32> to vector<8x24xf32>
    %cst_28 = arith.constant dense<0.000000e+00> : vector<8x128xf32>
    %129 = tpu.matmul %128, %126, %cst_28 {dimension_numbers = #tpu.dot_dimension_numbers<[1], [0], [0], [1], [0, 0, 1, 1], [], []>} : vector<8x24xf32>, vector<24x128xf32>, vector<8x128xf32> -> vector<8x128xf32>
    %c1_29 = arith.constant 1 : index
    %c0_30 = arith.constant 0 : index
    %c0_31 = arith.constant 0 : index
    %130 = vector.load %arg6[%c1_29, %c0_30, %c0_31] : memref<2x8x1xf32, #tpu.memory_space<vmem>>, vector<1x8x1xf32>
    %131 = vector.shape_cast %130 : vector<1x8x1xf32> to vector<8x1xf32>
    %132 = vector.broadcast %131 : vector<8x1xf32> to vector<8x128xf32>
    %133 = arith.addf %129, %132 : vector<8x128xf32>
    %134 = math.tanh %133 : vector<8x128xf32>
    %135 = arith.addf %93, %134 : vector<8x128xf32>
    %c0_32 = arith.constant 0 : index
    %c0_33 = arith.constant 0 : index
    %c0_34 = arith.constant 0 : index
    %136 = vector.load %arg7[%c0_32, %c0_33, %c0_34] : memref<1x8x128xf32, #tpu.memory_space<vmem>>, vector<1x8x128xf32>
    %137 = vector.shape_cast %136 : vector<1x8x128xf32> to vector<8x128xf32>
    %138 = vector.shape_cast %135 : vector<8x128xf32> to vector<1x8x128xf32>
    tpu.vector_store %arg7[%c0_32, %c0_33, %c0_34], %138 {strides = array<i32>} : memref<1x8x128xf32, #tpu.memory_space<vmem>>, vector<1x8x128xf32>,
    return
  }
  func.func @transform_0(%arg0: i32) -> (i32, i32, i32) {
    %c0_i32 = arith.constant 0 : i32
    %c0_i32_0 = arith.constant 0 : i32
    %c0_i32_1 = arith.constant 0 : i32
    return %arg0, %c0_i32, %c0_i32_0 : i32, i32, i32
  }
  func.func @transform_1(%arg0: i32) -> (i32, i32) {
    %c0_i32 = arith.constant 0 : i32
    %c0_i32_0 = arith.constant 0 : i32
    %c0_i32_1 = arith.constant 0 : i32
    return %c0_i32, %c0_i32_0 : i32, i32
  }
  func.func @transform_2(%arg0: i32) -> (i32, i32, i32) {
    %c0_i32 = arith.constant 0 : i32
    %c0_i32_0 = arith.constant 0 : i32
    %c0_i32_1 = arith.constant 0 : i32
    %c0_i32_2 = arith.constant 0 : i32
    return %c0_i32, %c0_i32_0, %c0_i32_1 : i32, i32, i32
  }
  func.func @transform_3(%arg0: i32) -> (i32, i32, i32) {
    %c0_i32 = arith.constant 0 : i32
    %c0_i32_0 = arith.constant 0 : i32
    %c0_i32_1 = arith.constant 0 : i32
    %c0_i32_2 = arith.constant 0 : i32
    return %c0_i32, %c0_i32_0, %c0_i32_1 : i32, i32, i32
  }
  func.func @transform_4(%arg0: i32) -> (i32, i32, i32) {
    %c0_i32 = arith.constant 0 : i32
    %c0_i32_0 = arith.constant 0 : i32
    %c0_i32_1 = arith.constant 0 : i32
    %c0_i32_2 = arith.constant 0 : i32
    return %c0_i32, %c0_i32_0, %c0_i32_1 : i32, i32, i32
  }
  func.func @transform_5(%arg0: i32) -> (i32, i32, i32) {
    %c0_i32 = arith.constant 0 : i32
    %c0_i32_0 = arith.constant 0 : i32
    %c0_i32_1 = arith.constant 0 : i32
    %c0_i32_2 = arith.constant 0 : i32
    return %c0_i32, %c0_i32_0, %c0_i32_1 : i32, i32, i32
  }
  func.func @transform_6(%arg0: i32) -> (i32, i32, i32) {
    %c0_i32 = arith.constant 0 : i32
    %c0_i32_0 = arith.constant 0 : i32
    %c0_i32_1 = arith.constant 0 : i32
    return %arg0, %c0_i32, %c0_i32_0 : i32, i32, i32
  }
}

</mosaic_0001>

<bundles_post_ra>
// kernel: tpu_custom_call.1
= control target key start
LH: loop header
LB: loop body
LE: loop exit
PB: predicated region body
PF: predicated region fallthrough
CT: control target
= control target key end

     0   :  { %6 = vsyncpa [#allocation3], 0  ;;  %s106_s0 = inlined_call_operand.hbm [shape: f32[8,128], index: 0, kind: input, shape index: {}]   ;;  %s107_s1 = inlined_call_operand.hbm [shape: f32[8,128], index: 1, kind: output, shape index: {}]  }
   0x1   :  { %7 = vsyncpa [#allocation4], 0  ;;  %s87_s6 = smov [#allocation2]  }
   0x2   :  { %s14_s7 = sshll.u32 %s87_s6, 4  ;;  %s15_s7 = int_to_ptr.vmem [resolvable:$true] %s14_s7 }
   0x3   :  { %s51_s8 = scalar_lea.vmem %s15_s7, 128  ;;  %p56_p1 = scmp.lt.s32.totalorder %s15_s7, %s15_s7 }
   0x4   :  { %p52_p0 = scmp.ne.s32.totalorder %s15_s7, %s51_s8  ;;  %p57_p2 = scmp.lt.s32.totalorder %s51_s8, %s51_s8 }
   0x6   :  { %p58_p3 = por %p57_p2, %p56_p1 }
   0x8   :  { %p59_p4 = pnand %p58_p3, %p52_p0 }
   0xa   :  { %62 = shalt.err (!%p59_p4)
}
   0xb   :  { %17 = dma.hbm_to_vmem [thread:$0]  %s106_s0, 128, %s15_s7, [#allocation3]  }
   0xc   :  { %83 = dma.done.wait [#allocation3], 128  }
   0xd   :  { %84 = vsyncadd [#allocation3], 4294967168  ;;  %v21_v0 = vld [vmem:[#allocation2] sm:$0xff]  ;;  %s88_s11 = smov 1   ;;  %s89_s12 = smov [#allocation5]  }
   0xe   :  { %22 = vrot.lane.b32.xlu0 %v21_v0, %s88_s11  ;;  %s31_s13 = sshll.u32 %s89_s12, 4  ;;  %s32_s13 = int_to_ptr.vmem [resolvable:$true] %s31_s13 }
   0xf   :  { %s63_s14 = scalar_lea.vmem %s32_s13, 128  ;;  %p68_p6 = scmp.lt.s32.totalorder %s32_s13, %s32_s13 }
  0x10   :  { %p64_p5 = scmp.ne.s32.totalorder %s32_s13, %s63_s14  ;;  %p69_p7 = scmp.lt.s32.totalorder %s63_s14, %s63_s14 }
  0x12   :  { %p70_p8 = por %p69_p7, %p68_p6 }
  0x14   :  { %p71_p9 = pnand %p70_p8, %p64_p5 }
  0x80   :  { %v23_v1 = vpop.permute.xlu0 %22 }
  0x81   :  { %24 = vst [vmem:[#allocation5] sm:$0xff] %v23_v1 }
  0x82   :  { %74 = shalt.err (!%p71_p9)
}
  0x83   :  { %34 = dma.vmem_to_hbm [thread:$0]  %s32_s13, 128, %s107_s1, [#allocation4]  }
  0x84   :  { %85 = dma.done.wait [#allocation4], 128  }
  0x85   :  { %86 = vsyncadd [#allocation4], 4294967168 }
  0x86   :  { %38 = vsyncpa [#allocation3], 1 }
  0x87   :  { %39 = vsyncpa [#allocation4], 1 }

// kernel: _interactor_impl.1
= control target key start
LH: loop header
LB: loop body
LE: loop exit
PB: predicated region body
PF: predicated region fallthrough
CT: control target
= control target key end

     0   :  { %s917_s21 = smov 0   ;;  %s1032_s0 = inlined_call_operand.vmem [shape: f32[2,8,128], index: 0, kind: input, shape index: {}]   ;;  %s1033_s1 = inlined_call_operand.vmem [shape: s32[1,128], index: 1, kind: input, shape index: {}]   ;;  %s1034_s2 = inlined_call_operand.vmem [shape: f32[2,8,40], index: 2, kind: input, shape index: {}]   ;;  %s1035_s3 = inlined_call_operand.vmem [shape: f32[2,8,1], index: 3, kind: input, shape index: {}]   ;;  %s1036_s4 = inlined_call_operand.vmem [shape: f32[2,8,24], index: 4, kind: input, shape index: {}]   ;;  %s1037_s5 = inlined_call_operand.vmem [shape: f32[2,8,1], index: 5, kind: input, shape index: {}]   ;;  %s1038_s6 = inlined_call_operand.vmem [shape: f32[2,8,128], index: 6, kind: output, shape index: {}]  }
   0x1 LB: > { %s757_s22 = sadd.s32 4294967295, %s870_s21   ;;  %p761_p0 = scmp.ge.s32.totalorder %s870_s21, 1  ;;  %s870_s21 = sphi %s917_s21, %s16_s21  }
   0x2   : > { %p211_p1 = scmp.lt.s32.totalorder %s870_s21, 3 }
   0x4   : > { %p212_p2 = pnand %p761_p0, %p211_p1 }
   0x5   : > { %p239_p3 = scmp.lt.s32.totalorder (!%p212_p2), %s757_s22, 1  ;;  %s875_s27 = smov (!%p212_p2), 124  }
   0x6   : > { %215 = sbr.rel (%p212_p2) target bundleno = 2040 (0x7f8), region = 44  ;;  %s876_s28 = smov (!%p212_p2), 126  }
   0x7   : > { %s877_s29 = smov (!%p212_p2), 125   ;;  %s878_s30 = smov (!%p212_p2), 127  }
   0x8   : > { %s879_s11 = smov (!%p212_p2), 3   ;;  %s880_s12 = smov (!%p212_p2), 1  }
   0x9   : > { %s881_s13 = smov (!%p212_p2), 2  }
   0xb   : > { %v872_v0 = vmov 0.0   ;;  %s1040_s22 = smov (!%p239_p3, %s757_s22), 1  ;;  %vm873_vm0 = vmmov 0   ;;  %v874_v2 = vmov 0   ;;  %v263_v3 = vld [vmem:[%s1035_s3] sm:$0xff]  ;;  %vm269_vm1 = vcmask 326656  }
   0xc   : > { %794 = vmatprep.subr.mxu0 %v872_v0  ;;  %807 = vmatprep.subr.mxu1 %v872_v0  ;;  %s762_s23 = sshll.u32 %s1040_s22, 3  ;;  %v262_v8 = vld [vmem:[%s1034_s2] sm:$0xff]  ;;  %vm362_vm2 = vcmask 195584   ;;  %v443_v25 = vlaneseq  ;;  %v767_v56 = vld [vmem:[%s1035_s3 + $0x8] sm:$0xff] }
   0xd   : > { %804 = vmatprep.mubr.msk.f32.mxu0 %vm873_vm0, %v872_v0  ;;  %813 = vmatprep.mubr.msk.f32.mxu1 %vm873_vm0, %v872_v0  ;;  %s242_s26 = scalar_lea.vmem %s1032_s0, %s762_s23  ;;  %v356_v15 = vld [vmem:[%s1037_s5] sm:$0xff]  ;;  %v766_v61 = vld [vmem:[%s1034_s2 + $0x8] sm:$0xff]  ;;  %s246_s9 = scalar_lea.vmem %s1038_s6, %s762_s23 }
   0xe   : > { %v939_v1 = vld [vmem:[%s242_s26] sm:$0xff]  ;;  %856 = vset.pattern.permute.xlu0 %v874_v2  ;;  %857 = vset.pattern.permute.xlu1 %v874_v2  ;;  %v444_v27 = vshrl.u32 %v443_v25, 7 }
   0xf   : > { %259 = vrot.lane.b32.xlu0 %v939_v1, %s875_s27  ;;  %253 = vrot.lane.b32.xlu1 %v939_v1, %s876_s28  ;;  %v355_v18 = vld [vmem:[%s1036_s4] sm:$0xff] }
  0x10   : > { %v248_v26 = vld [vmem:[%s1033_s1] sm:$0x1]  ;;  %v445_v28 = vsub.s32 0, %v444_v27 }
  0x11   : > { %vm437_vm3 = vcmp.eq.s32.totalorder %v248_v26, 2  ;;  %vm449_vm5 = vcmp.eq.s32.totalorder %v248_v26, 1  ;;  %vm461_vm7 = vcmp.eq.s32.totalorder %v248_v26, 0  ;;  %vm473_vm9 = vcmp.eq.s32.totalorder %v248_v26, 11 }
  0x12   : > { %v442_v29 = vsel %vm437_vm3, 1, %v874_v2  ;;  %v454_v33 = vsel %vm449_vm5, 1, %v874_v2  ;;  %v466_v37 = vsel %vm461_vm7, 1, %v874_v2  ;;  %v478_v41 = vsel %vm473_vm9, 1, %v874_v2 }
  0x13   : > { %256 = vrot.lane.b32.xlu0 %v939_v1, %s877_s29  ;;  %250 = vrot.lane.b32.xlu1 %v939_v1, %s878_s30  ;;  %v446_v30 = vrot.slane %v442_v29, %v445_v28  ;;  %v458_v34 = vrot.slane %v454_v33, %v445_v28  ;;  %v470_v38 = vrot.slane %v466_v37, %v445_v28  ;;  %vm485_vm11 = vcmp.eq.s32.totalorder %v248_v26, 12 }
  0x14   : > { %v482_v42 = vrot.slane %v478_v41, %v445_v28  ;;  %v490_v45 = vsel %vm485_vm11, 1, %v874_v2  ;;  %vm497_vm13 = vcmp.eq.s32.totalorder %v248_v26, 13 }
  0x15   : > { %vm447_vm4 = vcmp.eq.s32.totalorder %v446_v30, 1  ;;  %vm459_vm6 = vcmp.eq.s32.totalorder %v458_v34, 1  ;;  %vm471_vm8 = vcmp.eq.s32.totalorder %v470_v38, 1  ;;  %v494_v46 = vrot.slane %v490_v45, %v445_v28 }
  0x16   : > { %vm483_vm10 = vcmp.eq.s32.totalorder %v482_v42, 1  ;;  %v502_v49 = vsel %vm497_vm13, 1, %v874_v2 }
  0x17   : > { %266 = vperm.xlu0 %856, %v263_v3   ;;  %vm495_vm12 = vcmp.eq.s32.totalorder %v494_v46, 1  ;;  %v506_v50 = vrot.slane %v502_v49, %v445_v28 }
  0x19   : > { %vm507_vm14 = vcmp.eq.s32.totalorder %v506_v50, 1 }
  0x81   : > { %v260_v4 = vpop.permute.xlu0 %259  ;;  %v254_v5 = vpop.permute.xlu1 %253 }
  0x82   : > { %795 = vmatpush3.msra.mxu0 %v260_v4 }
  0x83   : > { %796 = vmatprep.subr.mxu0 %v872_v0 }
  0x85   : > { %v257_v6 = vpop.permute.xlu0 %256  ;;  %v251_v7 = vpop.permute.xlu1 %250 }
  0x86   : > { %797 = vmatpush3.msra.mxu0 %v257_v6 }
  0x87   : > { %798 = vmatprep.subr.mxu0 %v872_v0 }
  0x88   : > { %799 = vmatpush3.msra.mxu0 %v254_v5  ;;  %v770_v5 = vld [vmem:[%s1037_s5 + $0x8] sm:$0xff] }
  0x89   : > { %800 = vmatprep.subr.mxu0 %v872_v0 }
  0x8a   : > { %801 = vmatpush3.msra.mxu0 %v251_v7 }
  0x8b   : > { %802 = vmatprep.subr.mxu0 %v872_v0 }
  0x8c   : > { %803 = vmatpush3.msra.mxu0 %v939_v1 }
  0x8d   : > { %805 = vmatmul.mubr.msk.f32.vlgmr.msra.gmra.mxu0 %vm269_vm1, %v262_v8  ;;  %829 = vmatprep.subr.mxu0 %v872_v0  ;;  %v769_v8 = vld [vmem:[%s1036_s4 + $0x8] sm:$0xff] }
  0x8e   : > { %835 = vmatprep.mubr.msk.f32.mxu0 %vm873_vm0, %v872_v0 }
  0x92   : > { %v267_v9 = vpop.permute.xlu0 %266 }
 0x14d   : > { %v339_v10 = vpop.f32.mrf.mxu0 }
 0x14e   : > { %v340_v11 = vadd.f32 %v339_v10, %v267_v9 }
 0x14f   : > { %v806_v12 = vpop.f32.mrf.mxu0 }
 0x150   : > { %v343_v13 = vmul.f32 0.01, %v340_v11 }
 0x152   : > { %v344_v14 = vmax.f32 %v340_v11, %v343_v13 }
 0x154   : > { %346 = vrot.lane.b32.xlu0 %v344_v14, %s879_s11  ;;  %352 = vrot.lane.b32.xlu1 %v344_v14, %s880_s12 }
 0x158   : > { %349 = vrot.lane.b32.xlu1 %v344_v14, %s881_s13 }
 0x15c   : > { %359 = vperm.xlu1 %857, %v356_v15  }
 0x1c6   : > { %v353_v16 = vpop.permute.xlu1 %352  ;;  %v347_v19 = vpop.permute.xlu0 %346 }
 0x1c7   : > { %808 = vmatpush3.msra.mxu1 %v353_v16 }
 0x1c8   : > { %809 = vmatprep.subr.mxu1 %v872_v0 }
 0x1ca   : > { %v350_v17 = vpop.permute.xlu1 %349 }
 0x1cb   : > { %810 = vmatpush3.msra.mxu1 %v350_v17 }
 0x1cc   : > { %811 = vmatprep.subr.mxu1 %v872_v0 }
 0x1cd   : > { %812 = vmatpush3.msra.mxu1 %v347_v19 }
 0x1ce   : > { %814 = vmatmul.mubr.msk.f32.vlgmr.msra.gmra.mxu1 %vm362_vm2, %v355_v18  ;;  %816 = vmatprep.subr.mxu1 %v872_v0 }
 0x1cf   : > { %826 = vmatprep.mubr.msk.f32.mxu1 %vm873_vm0, %v872_v0 }
 0x1d7   : > { %v360_v20 = vpop.permute.xlu1 %359 }
 0x28e   : > { %v432_v21 = vpop.f32.mrf.mxu1 }
 0x28f   : > { %v433_v22 = vadd.f32 %v432_v21, %v360_v20 }
 0x290   : > { %v815_v23 = vpop.f32.mrf.mxu1 }
 0x291   : > { %858 = vtanh.f32 %v433_v22 }
 0x29e   : > { %v859_v24 = vpop.eup %858 }
 0x29f   : > { %439 = vrot.lane.b32.xlu0 %v859_v24, %s878_s30 }
 0x311   : > { %v440_v31 = vpop.permute.xlu0 %439 }
 0x312   : > { %v448_v32 = vsel %vm447_vm4, %v440_v31, %v859_v24 }
 0x313   : > { %451 = vrot.lane.b32.xlu1 %v448_v32, %s876_s28 }
 0x385   : > { %v452_v35 = vpop.permute.xlu1 %451 }
 0x386   : > { %v460_v36 = vsel %vm459_vm6, %v452_v35, %v448_v32 }
 0x387   : > { %463 = vrot.lane.b32.xlu0 %v460_v36, %s877_s29 }
 0x3f9   : > { %v464_v39 = vpop.permute.xlu0 %463 }
 0x3fa   : > { %v472_v40 = vsel %vm471_vm8, %v464_v39, %v460_v36 }
 0x3fb   : > { %475 = vrot.lane.b32.xlu1 %v472_v40, %s880_s12 }
 0x46d   : > { %v476_v43 = vpop.permute.xlu1 %475 }
 0x46e   : > { %v484_v44 = vsel %vm483_vm10, %v476_v43, %v472_v40 }
 0x46f   : > { %487 = vrot.lane.b32.xlu0 %v484_v44, %s881_s13 }
 0x4e1   : > { %v488_v47 = vpop.permute.xlu0 %487 }
 0x4e2   : > { %v496_v48 = vsel %vm495_vm12, %v488_v47, %v484_v44 }
 0x4e3   : > { %499 = vrot.lane.b32.xlu1 %v496_v48, %s879_s11 }
 0x555   : > { %v500_v51 = vpop.permute.xlu1 %499 }
 0x556   : > { %v508_v52 = vsel %vm507_vm14, %v500_v51, %v496_v48 }
 0x557   : > { %v509_v53 = vmul.f32 1.442695, %v508_v52 }
 0x559   : > { %860 = vpow2.f32 %v509_v53 }
 0x566   : > { %v861_v54 = vpop.eup %860 }
 0x567   : > { %v511_v55 = vmul.f32 %v861_v54, %v939_v1 }
 0x569   : > { %519 = vrot.lane.b32.xlu1 %v511_v55, %s877_s29  ;;  %522 = vrot.lane.b32.xlu0 %v511_v55, %s875_s27 }
 0x56d   : > { %513 = vrot.lane.b32.xlu1 %v511_v55, %s878_s30  ;;  %516 = vrot.lane.b32.xlu0 %v511_v55, %s876_s28 }
 0x571   : > { %531 = vperm.xlu0 %856, %v767_v56  }
 0x5db   : > { %v520_v57 = vpop.permute.xlu1 %519  ;;  %v523_v58 = vpop.permute.xlu0 %522 }
 0x5dc   : > { %817 = vmatpush3.msra.mxu1 %v523_v58 }
 0x5dd   : > { %818 = vmatprep.subr.mxu1 %v872_v0 }
 0x5de   : > { %819 = vmatpush3.msra.mxu1 %v520_v57 }
 0x5df   : > { %820 = vmatprep.subr.mxu1 %v872_v0  ;;  %v517_v59 = vpop.permute.xlu0 %516  ;;  %v514_v60 = vpop.permute.xlu1 %513 }
 0x5e0   : > { %821 = vmatpush3.msra.mxu1 %v517_v59 }
 0x5e1   : > { %822 = vmatprep.subr.mxu1 %v872_v0 }
 0x5e2   : > { %823 = vmatpush3.msra.mxu1 %v514_v60 }
 0x5e3   : > { %824 = vmatprep.subr.mxu1 %v872_v0 }
 0x5e4   : > { %825 = vmatpush3.msra.mxu1 %v511_v55 }
 0x5e5   : > { %827 = vmatmul.mubr.msk.f32.vlgmr.msra.gmra.mxu1 %vm269_vm1, %v766_v61 }
 0x5ec   : > { %v532_v62 = vpop.permute.xlu0 %531 }
 0x6a5   : > { %v603_v63 = vpop.f32.mrf.mxu1 }
 0x6a6   : > { %v604_v1 = vadd.f32 %v603_v63, %v532_v62 }
 0x6a7   : > { %v828_v2 = vpop.f32.mrf.mxu1 }
 0x6a8   : > { %v607_v3 = vmul.f32 0.01, %v604_v1 }
 0x6aa   : > { %v608_v4 = vmax.f32 %v604_v1, %v607_v3 }
 0x6ac   : > { %613 = vrot.lane.b32.xlu0 %v608_v4, %s881_s13  ;;  %616 = vrot.lane.b32.xlu1 %v608_v4, %s880_s12 }
 0x6b0   : > { %625 = vperm.xlu0 %856, %v770_v5   ;;  %610 = vrot.lane.b32.xlu1 %v608_v4, %s879_s11 }
 0x71e   : > { %v617_v6 = vpop.permute.xlu1 %616  ;;  %v614_v7 = vpop.permute.xlu0 %613 }
 0x71f   : > { %830 = vmatpush3.msra.mxu0 %v617_v6 }
 0x720   : > { %831 = vmatprep.subr.mxu0 %v872_v0 }
 0x721   : > { %832 = vmatpush3.msra.mxu0 %v614_v7 }
 0x722   : > { %833 = vmatprep.subr.mxu0 %v872_v0  ;;  %v611_v9 = vpop.permute.xlu1 %610 }
 0x723   : > { %834 = vmatpush3.msra.mxu0 %v611_v9 }
 0x724   : > { %836 = vmatmul.mubr.msk.f32.vlgmr.msra.gmra.mxu0 %vm362_vm2, %v769_v8 }
 0x72b   : > { %v626_v10 = vpop.permute.xlu0 %625 }
 0x7e4   : > { %v697_v11 = vpop.f32.mrf.mxu0 }
 0x7e5   : > { %v698_v12 = vadd.f32 %v697_v11, %v626_v10 }
 0x7e6   : > { %v837_v13 = vpop.f32.mrf.mxu0 }
 0x7e7   : > { %862 = vtanh.f32 %v698_v12 }
 0x7f4   : > { %v863_v14 = vpop.eup %862 }
 0x7f5   : > { %v702_v15 = vadd.f32 %v863_v14, %v511_v55 }
 0x7f7   : > { %703 = vst [vmem:[%s246_s9] sm:$0xff] %v702_v15 }
 0x7f8 PF: > { %s16_s21 = sadd.s32 1, %s870_s21  }
 0x7f9   : > { %p13_p4 = scmp.ge.s32.totalorder %s16_s21, 4  }
 0x7fb   :  { %15 = sbr.rel (!%p13_p4) target bundleno = 1 (0x1), region = 78 }

</bundles_post_ra>
